<compile_context>
chip_gen: v7x
topology: tpu7x:2x2x1
jax: 0.10.0
libtpu: 0.0.40
codegen_flags: <defaults>
</compile_context>

<pallas_src>
import jax
import jax.numpy as jnp
from jax.experimental import pallas as pl
from jax.experimental.pallas import tpu as pltpu

IN_F = 4        # observation features (CartPole)
HIDDEN = 128    # affine1 output features
HEAD_PAD = 128  # fused head weight padded to a full lane width (MXU-friendly)
OUT_W = 8       # narrow output slab: [p0, p1, value, 0, 0, 0, 0, 0]


def policy_kernel(x_ref, w1_ref, b1_ref, w23_ref, b23_ref, out_ref):
    # ---- hidden layer: Linear(4 -> 128) + ReLU --------------------------
    # K=4 is 4/128 of the MXU contraction depth, so do it as 4 VPU
    # broadcast-FMAs (avoids MXU push/pop latency and LHS relayout).
    x = x_ref[...]                       # [TB, 4]
    w1 = w1_ref[...]                     # [4, 128]
    h = b1_ref[...]                      # [1, 128] broadcast
    h = h + x[:, 0:1] * w1[0:1, :]
    h = h + x[:, 1:2] * w1[1:2, :]
    h = h + x[:, 2:3] * w1[2:3, :]
    h = h + x[:, 3:4] * w1[3:4, :]
    h = jnp.maximum(h, 0.0)              # [TB, 128]

    # ---- fused heads: one MXU matmul; [TB, 128] stays VMEM-only ---------
    # cols 0,1 = action scores ; col 2 = state value ; cols 3..127 = 0
    y = jnp.dot(h, w23_ref[...], preferred_element_type=jnp.float32)
    y = y + b23_ref[...]                 # [TB, 128]

    # ---- 2-class softmax == sigmoid of the score difference -------------
    # Lane-dense diff: z_slab[:, i] = y[:, i] - y[:, i+1]; the roll rides
    # the otherwise-idle XLU slot (shift 127 == -1 on a 128-lane axis).
    z_slab = y - pltpu.roll(y, shift=HEAD_PAD - 1, axis=1)
    z = z_slab[:, 0:1]                   # s0 - s1, [TB, 1]
    # Single EUP tanh; numerically stable; p0 + p1 == 1 by construction.
    p0 = 0.5 * (1.0 + jnp.tanh(0.5 * z))
    p1 = 1.0 - p0
    v = y[:, 2:3]                        # state value, [TB, 1]

    # ---- narrow 8-lane output (16x less HBM writeback than a 128 slab) --
    lane = jax.lax.broadcasted_iota(jnp.int32, out_ref.shape, 1)
    out_ref[...] = jnp.where(lane == 0, p0,
                             jnp.where(lane == 1, p1,
                                       jnp.where(lane == 2, v, 0.0)))


def pack_params(w1, b1, w2, b2, w3, b3):
    """Pack the two heads into one zero-padded [128, 128] weight/bias."""
    w23 = jnp.zeros((HIDDEN, HEAD_PAD), jnp.float32)
    w23 = w23.at[:, 0:2].set(w2).at[:, 2:3].set(w3)
    b23 = jnp.zeros((1, HEAD_PAD), jnp.float32)
    b23 = b23.at[:, 0:2].set(b2).at[:, 2:3].set(b3)
    return w1, b1, w23, b23


def _choose_tiles(batch, tb_max):
    """Row-tile size (multiple of 8) and tile count (even, for v7x's 2 TCs)."""
    if batch <= 64:                       # tiny / latency-bound: single tile
        return max(8, pl.cdiv(batch, 8) * 8), 1
    ntiles = pl.cdiv(pl.cdiv(batch, tb_max), 2) * 2   # even grid length
    tb = pl.cdiv(pl.cdiv(batch, ntiles), 8) * 8
    return tb, ntiles


def policy_forward(x, w1, b1, w23, b23, *, tb_max=2048):
    """x: [B, 4] float32. Returns (probs [B, 2], values [B, 1])."""
    B = x.shape[0]
    tb, ntiles = _choose_tiles(B, tb_max)
    bp = tb * ntiles
    if bp != B:
        # TODO(synk): padded rows compute garbage that is sliced off below;
        # revisit if a batch-axis reduction (entropy/loss) is ever fused in.
        x = jnp.pad(x, ((0, bp - B), (0, 0)))

    out = pl.pallas_call(
        policy_kernel,
        out_shape=jax.ShapeDtypeStruct((bp, OUT_W), jnp.float32),
        grid=(ntiles,),
        in_specs=[
            pl.BlockSpec((tb, IN_F), lambda i: (i, 0)),            # x tile
            pl.BlockSpec((IN_F, HIDDEN), lambda i: (0, 0)),        # w1 (resident)
            pl.BlockSpec((1, HIDDEN), lambda i: (0, 0)),           # b1 (resident)
            pl.BlockSpec((HIDDEN, HEAD_PAD), lambda i: (0, 0)),    # w23 (resident)
            pl.BlockSpec((1, HEAD_PAD), lambda i: (0, 0)),         # b23 (resident)
        ],
        out_specs=pl.BlockSpec((tb, OUT_W), lambda i: (i, 0)),
        compiler_params=pltpu.CompilerParams(
            dimension_semantics=("parallel",)),
    )(x, w1, b1, w23, b23)

    probs = out[:B, 0:2]
    values = out[:B, 2:3]
    return probs, values


def init_params(key):
    """Deterministic init matching the nn.Linear shapes of Policy.__init__."""
    k1, k2, k3, k4, k5, k6 = jax.random.split(key, 6)
    # Stored as [in, out] (transpose of PyTorch's [out, in]).
    w1 = jax.random.normal(k1, (4, 128), jnp.float32) * 0.1
    b1 = jax.random.normal(k2, (1, 128), jnp.float32) * 0.01
    w2 = jax.random.normal(k3, (128, 2), jnp.float32) * 0.1
    b2 = jax.random.normal(k4, (1, 2), jnp.float32) * 0.01
    w3 = jax.random.normal(k5, (128, 1), jnp.float32) * 0.1
    b3 = jax.random.normal(k6, (1, 1), jnp.float32) * 0.01
    return w1, b1, w2, b2, w3, b3


if __name__ == "__main__":
    key = jax.random.PRNGKey(0)
    k_params, k_x1, k_x2 = jax.random.split(key, 3)
    w1, b1, w2, b2, w3, b3 = init_params(k_params)
    packed = pack_params(w1, b1, w2, b2, w3, b3)

    fwd = jax.jit(policy_forward, static_argnames=("tb_max",))

    hp = jax.lax.Precision.HIGHEST   # true-f32 reference (matches kernel f32 path)

    def reference(x):
        h = jnp.maximum(jnp.dot(x, w1, precision=hp) + b1, 0.0)
        scores = jnp.dot(h, w2, precision=hp) + b2
        values = jnp.dot(h, w3, precision=hp) + b3
        return jax.nn.softmax(scores, axis=-1), values

    # ---- small CartPole-sized batch (obs dim 4), single-tile path -------
    B1 = 8
    x1 = jax.random.normal(k_x1, (B1, 4), jnp.float32)
    probs1, values1 = fwd(x1, *packed)
    jax.block_until_ready((probs1, values1))
    p_ref1, v_ref1 = reference(x1)
    assert probs1.shape == (B1, 2) and values1.shape == (B1, 1)
    assert jnp.allclose(probs1, p_ref1, atol=1e-5, rtol=1e-5)
    assert jnp.allclose(values1, v_ref1, atol=1e-5, rtol=1e-5)
    assert jnp.allclose(jnp.sum(probs1, axis=-1), 1.0, atol=1e-6)

    # ---- larger batch exercising padding + the even 2-tile grid ---------
    B2 = 500   # -> tb=256, grid=(2,): balanced across v7x's two TensorCores
    x2 = jax.random.normal(k_x2, (B2, 4), jnp.float32)
    probs2, values2 = fwd(x2, *packed)
    jax.block_until_ready((probs2, values2))
    p_ref2, v_ref2 = reference(x2)
    assert probs2.shape == (B2, 2) and values2.shape == (B2, 1)
    assert jnp.allclose(probs2, p_ref2, atol=1e-5, rtol=1e-5)
    assert jnp.allclose(values2, v_ref2, atol=1e-5, rtol=1e-5)

    # TODO(synk): at single-step RL batch sizes (B~8) wall time is launch/DMA
    # dominated; amortize by batching multiple env instances per call.
    print("KERNEL_OK")
</pallas_src>

<mosaic_0001>
module attributes {stable_mosaic.version = 11 : i64} {
  func.func @policy_kernel(%arg0: i32, %arg1: memref<8x4xf32, #tpu.memory_space<vmem>>, %arg2: memref<4x128xf32, #tpu.memory_space<vmem>>, %arg3: memref<1x128xf32, #tpu.memory_space<vmem>>, %arg4: memref<128x128xf32, #tpu.memory_space<vmem>>, %arg5: memref<1x128xf32, #tpu.memory_space<vmem>>, %arg6: memref<8x8xf32, #tpu.memory_space<vmem>>) attributes {dimension_semantics = [#tpu.dimension_semantics<parallel>], iteration_bounds = array<i64: 1>, scalar_prefetch = 0 : i64, scratch_operands = 0 : i64, tpu.core_type = #tpu.core_type<tc>, window_params = [{transform_indices = @transform_0, window_bounds = array<i64: 8, 4>}, {pipeline_mode = #tpu.pipeline_mode<synchronous>, transform_indices = @transform_1, window_bounds = array<i64: 4, 128>}, {pipeline_mode = #tpu.pipeline_mode<synchronous>, transform_indices = @transform_2, window_bounds = array<i64: 1, 128>}, {pipeline_mode = #tpu.pipeline_mode<synchronous>, transform_indices = @transform_3, window_bounds = array<i64: 128, 128>}, {pipeline_mode = #tpu.pipeline_mode<synchronous>, transform_indices = @transform_4, window_bounds = array<i64: 1, 128>}, {transform_indices = @transform_5, window_bounds = array<i64: 8, 8>}]} {
    %c0 = arith.constant 0 : index
    %c0_0 = arith.constant 0 : index
    %0 = vector.load %arg1[%c0, %c0_0] : memref<8x4xf32, #tpu.memory_space<vmem>>, vector<8x4xf32>
    %c0_1 = arith.constant 0 : index
    %c0_2 = arith.constant 0 : index
    %1 = vector.load %arg2[%c0_1, %c0_2] : memref<4x128xf32, #tpu.memory_space<vmem>>, vector<4x128xf32>
    %c0_3 = arith.constant 0 : index
    %c0_4 = arith.constant 0 : index
    %2 = vector.load %arg3[%c0_3, %c0_4] : memref<1x128xf32, #tpu.memory_space<vmem>>, vector<1x128xf32>
    %3 = vector.extract_strided_slice %0 {offsets = [0, 0], sizes = [8, 1], strides = [1, 1]} : vector<8x4xf32> to vector<8x1xf32>
    %4 = vector.extract_strided_slice %1 {offsets = [0, 0], sizes = [1, 128], strides = [1, 1]} : vector<4x128xf32> to vector<1x128xf32>
    %5 = vector.broadcast %3 : vector<8x1xf32> to vector<8x128xf32>
    %6 = vector.broadcast %4 : vector<1x128xf32> to vector<8x128xf32>
    %7 = arith.mulf %5, %6 : vector<8x128xf32>
    %8 = vector.broadcast %2 : vector<1x128xf32> to vector<8x128xf32>
    %9 = arith.addf %8, %7 : vector<8x128xf32>
    %10 = vector.extract_strided_slice %0 {offsets = [0, 1], sizes = [8, 1], strides = [1, 1]} : vector<8x4xf32> to vector<8x1xf32>
    %11 = vector.extract_strided_slice %1 {offsets = [1, 0], sizes = [1, 128], strides = [1, 1]} : vector<4x128xf32> to vector<1x128xf32>
    %12 = vector.broadcast %10 : vector<8x1xf32> to vector<8x128xf32>
    %13 = vector.broadcast %11 : vector<1x128xf32> to vector<8x128xf32>
    %14 = arith.mulf %12, %13 : vector<8x128xf32>
    %15 = arith.addf %9, %14 : vector<8x128xf32>
    %16 = vector.extract_strided_slice %0 {offsets = [0, 2], sizes = [8, 1], strides = [1, 1]} : vector<8x4xf32> to vector<8x1xf32>
    %17 = vector.extract_strided_slice %1 {offsets = [2, 0], sizes = [1, 128], strides = [1, 1]} : vector<4x128xf32> to vector<1x128xf32>
    %18 = vector.broadcast %16 : vector<8x1xf32> to vector<8x128xf32>
    %19 = vector.broadcast %17 : vector<1x128xf32> to vector<8x128xf32>
    %20 = arith.mulf %18, %19 : vector<8x128xf32>
    %21 = arith.addf %15, %20 : vector<8x128xf32>
    %22 = vector.extract_strided_slice %0 {offsets = [0, 3], sizes = [8, 1], strides = [1, 1]} : vector<8x4xf32> to vector<8x1xf32>
    %23 = vector.extract_strided_slice %1 {offsets = [3, 0], sizes = [1, 128], strides = [1, 1]} : vector<4x128xf32> to vector<1x128xf32>
    %24 = vector.broadcast %22 : vector<8x1xf32> to vector<8x128xf32>
    %25 = vector.broadcast %23 : vector<1x128xf32> to vector<8x128xf32>
    %26 = arith.mulf %24, %25 : vector<8x128xf32>
    %27 = arith.addf %21, %26 : vector<8x128xf32>
    %cst = arith.constant 0.000000e+00 : f32
    %28 = vector.broadcast %cst : f32 to vector<8x128xf32>
    %29 = arith.maximumf %27, %28 : vector<8x128xf32>
    %c0_5 = arith.constant 0 : index
    %c0_6 = arith.constant 0 : index
    %30 = vector.load %arg4[%c0_5, %c0_6] : memref<128x128xf32, #tpu.memory_space<vmem>>, vector<128x128xf32>
    %cst_7 = arith.constant dense<0.000000e+00> : vector<8x128xf32>
    %31 = tpu.matmul %29, %30, %cst_7 {dimension_numbers = #tpu.dot_dimension_numbers<[1], [0], [0], [1], [0, 0, 1, 1], [], []>} : vector<8x128xf32>, vector<128x128xf32>, vector<8x128xf32> -> vector<8x128xf32>
    %c0_8 = arith.constant 0 : index
    %c0_9 = arith.constant 0 : index
    %32 = vector.load %arg5[%c0_8, %c0_9] : memref<1x128xf32, #tpu.memory_space<vmem>>, vector<1x128xf32>
    %33 = vector.broadcast %32 : vector<1x128xf32> to vector<8x128xf32>
    %34 = arith.addf %31, %33 : vector<8x128xf32>
    %c127_i32 = arith.constant 127 : i32
    %35 = tpu.dynamic_rotate %34 by %c127_i32 dim 1 : vector<8x128xf32>, i32 -> vector<8x128xf32>
    %36 = arith.subf %34, %35 : vector<8x128xf32>
    %37 = vector.extract_strided_slice %36 {offsets = [0, 0], sizes = [8, 1], strides = [1, 1]} : vector<8x128xf32> to vector<8x1xf32>
    %cst_10 = arith.constant 5.000000e-01 : f32
    %38 = vector.broadcast %cst_10 : f32 to vector<8x1xf32>
    %39 = arith.mulf %38, %37 : vector<8x1xf32>
    %40 = math.tanh %39 : vector<8x1xf32>
    %cst_11 = arith.constant 1.000000e+00 : f32
    %41 = vector.broadcast %cst_11 : f32 to vector<8x1xf32>
    %42 = arith.addf %41, %40 : vector<8x1xf32>
    %cst_12 = arith.constant 5.000000e-01 : f32
    %43 = vector.broadcast %cst_12 : f32 to vector<8x1xf32>
    %44 = arith.mulf %43, %42 : vector<8x1xf32>
    %cst_13 = arith.constant 1.000000e+00 : f32
    %45 = vector.broadcast %cst_13 : f32 to vector<8x1xf32>
    %46 = arith.subf %45, %44 : vector<8x1xf32>
    %47 = vector.extract_strided_slice %34 {offsets = [0, 2], sizes = [8, 1], strides = [1, 1]} : vector<8x128xf32> to vector<8x1xf32>
    %48 = tpu.iota {dimensions = array<i32: 1>} : vector<8x8xi32>
    %c0_i32 = arith.constant 0 : i32
    %49 = vector.broadcast %c0_i32 : i32 to vector<8x8xi32>
    %50 = arith.cmpi eq, %48, %49 : vector<8x8xi32>
    %c1_i32 = arith.constant 1 : i32
    %51 = vector.broadcast %c1_i32 : i32 to vector<8x8xi32>
    %52 = arith.cmpi eq, %48, %51 : vector<8x8xi32>
    %c2_i32 = arith.constant 2 : i32
    %53 = vector.broadcast %c2_i32 : i32 to vector<8x8xi32>
    %54 = arith.cmpi eq, %48, %53 : vector<8x8xi32>
    %cst_14 = arith.constant 0.000000e+00 : f32
    %55 = vector.shape_cast %47 : vector<8x1xf32> to vector<8x1xf32>
    %56 = vector.broadcast %55 : vector<8x1xf32> to vector<8x8xf32>
    %57 = vector.broadcast %cst_14 : f32 to vector<8x8xf32>
    %58 = arith.select %54, %56, %57 : vector<8x8xi1>, vector<8x8xf32>
    %59 = vector.shape_cast %46 : vector<8x1xf32> to vector<8x1xf32>
    %60 = vector.broadcast %59 : vector<8x1xf32> to vector<8x8xf32>
    %61 = arith.select %52, %60, %58 : vector<8x8xi1>, vector<8x8xf32>
    %62 = vector.shape_cast %44 : vector<8x1xf32> to vector<8x1xf32>
    %63 = vector.broadcast %62 : vector<8x1xf32> to vector<8x8xf32>
    %64 = arith.select %50, %63, %61 : vector<8x8xi1>, vector<8x8xf32>
    %c0_15 = arith.constant 0 : index
    %c0_16 = arith.constant 0 : index
    %65 = vector.load %arg6[%c0_15, %c0_16] : memref<8x8xf32, #tpu.memory_space<vmem>>, vector<8x8xf32>
    tpu.vector_store %arg6[%c0_15, %c0_16], %64 {strides = array<i32>} : memref<8x8xf32, #tpu.memory_space<vmem>>, vector<8x8xf32>,
    return
  }
  func.func @transform_0(%arg0: i32) -> (i32, i32) {
    %c0_i32 = arith.constant 0 : i32
    %c0_i32_0 = arith.constant 0 : i32
    return %arg0, %c0_i32 : i32, i32
  }
  func.func @transform_1(%arg0: i32) -> (i32, i32) {
    %c0_i32 = arith.constant 0 : i32
    %c0_i32_0 = arith.constant 0 : i32
    %c0_i32_1 = arith.constant 0 : i32
    return %c0_i32, %c0_i32_0 : i32, i32
  }
  func.func @transform_2(%arg0: i32) -> (i32, i32) {
    %c0_i32 = arith.constant 0 : i32
    %c0_i32_0 = arith.constant 0 : i32
    %c0_i32_1 = arith.constant 0 : i32
    return %c0_i32, %c0_i32_0 : i32, i32
  }
  func.func @transform_3(%arg0: i32) -> (i32, i32) {
    %c0_i32 = arith.constant 0 : i32
    %c0_i32_0 = arith.constant 0 : i32
    %c0_i32_1 = arith.constant 0 : i32
    return %c0_i32, %c0_i32_0 : i32, i32
  }
  func.func @transform_4(%arg0: i32) -> (i32, i32) {
    %c0_i32 = arith.constant 0 : i32
    %c0_i32_0 = arith.constant 0 : i32
    %c0_i32_1 = arith.constant 0 : i32
    return %c0_i32, %c0_i32_0 : i32, i32
  }
  func.func @transform_5(%arg0: i32) -> (i32, i32) {
    %c0_i32 = arith.constant 0 : i32
    %c0_i32_0 = arith.constant 0 : i32
    return %arg0, %c0_i32 : i32, i32
  }
}

</mosaic_0001>

<bundles_post_ra>
// kernel: policy_forward.1
= control target key start
LH: loop header
LB: loop body
LE: loop exit
PB: predicated region body
PF: predicated region fallthrough
CT: control target
= control target key end

     0   :  { %10 = vsyncpa [#allocation3], 0  ;;  %s338_s18 = smov [#allocation2]   ;;  %s409_s0 = inlined_call_operand.vmem [shape: f32[8,4], index: 0, kind: input, shape index: {}]   ;;  %s410_s1 = inlined_call_operand.vmem [shape: f32[4,128], index: 1, kind: input, shape index: {}]   ;;  %s411_s2 = inlined_call_operand.vmem [shape: f32[1,128], index: 2, kind: input, shape index: {}]   ;;  %s412_s3 = inlined_call_operand.hbm [shape: f32[128,128], index: 3, kind: input, shape index: {}]   ;;  %s413_s4 = inlined_call_operand.vmem [shape: f32[1,128], index: 4, kind: input, shape index: {}]   ;;  %s414_s5 = inlined_call_operand.vmem [shape: f32[8,8], index: 5, kind: output, shape index: {}]  }
   0x1   :  { %s22_s19 = sshll.u32 %s338_s18, 4  ;;  %s314_s22 = scalar_lea.hbm %s412_s3, 2048  ;;  %s23_s19 = int_to_ptr.vmem [resolvable:$true] %s22_s19 }
   0x2   :  { %p315_p0 = scmp.ne.s32.totalorder %s412_s3, %s314_s22  ;;  %p318_p1 = scmp.lt.u32.totalorder %s314_s22, %s412_s3 }
   0x4   :  { %p320_p2 = pnand %p318_p1, %p315_p0 }
   0x6   :  { %323 = shalt.err (!%p320_p2)
}
   0x7   :  { %s324_s27 = scalar_lea.vmem %s23_s19, 2048  ;;  %p329_p4 = scmp.lt.s32.totalorder %s23_s19, %s23_s19 }
   0x8   :  { %p325_p3 = scmp.ne.s32.totalorder %s23_s19, %s324_s27  ;;  %p330_p5 = scmp.lt.s32.totalorder %s324_s27, %s324_s27 }
   0xa   :  { %p331_p6 = por %p330_p5, %p329_p4 }
   0xc   :  { %p332_p7 = pnand %p331_p6, %p325_p3 }
   0xe   :  { %335 = shalt.err (!%p332_p7)
}
   0xf   :  { %s339_s28 = smov 128   ;;  %s340_s29 = smov 8  }
  0x10   :  { %28 = dma.hbm_to_vmem [thread:$0]  %s412_s3, 2048, %s23_s19, [#allocation3], %s339_s28, %s339_s28, %s340_s29  }
  0x11   :  { %336 = dma.done.wait [#allocation3], 2048  }
  0x12   :  { %337 = vsyncadd [#allocation3], 4294965248  ;;  %v341_v0 = vmov 0   ;;  %v342_v1 = vmov 2   ;;  %v343_v2 = vmov 0.0|0.0   ;;  %v34_v3 = vld [vmem:[%s409_s0] sm:$0xff]  ;;  %v42_v31 = vlaneseq }
  0x13   :  { %305 = vset.pattern.permute.xlu0 %v341_v0  ;;  %307 = vset.pattern.permute.xlu1 %v342_v1  ;;  %v85_v4 = vld [vmem:[#allocation2] sm:$0xff]  ;;  %v86_v5 = vld [vmem:[#allocation2 + $0x8] sm:$0xff]  ;;  %v87_v7 = vld [vmem:[#allocation2 + $0x10] sm:$0xff]  ;;  %v344_v12 = vmov 1   ;;  %v345_v13 = vmov 3   ;;  %vm346_vm0 = vmmov 0  }
  0x14   :  { %270 = vmatprep.subr.bf16.mxu0 %v343_v2  ;;  %39 = vperm.xlu0 %305, %v34_v3   ;;  %v271_v6 = vpack.c.bf16 %v86_v5, %v85_v4  ;;  %v88_v8 = vld [vmem:[#allocation2 + $0x18] sm:$0xff]  ;;  %v89_v10 = vld [vmem:[#allocation2 + $0x20] sm:$0xff]  ;;  %v90_v11 = vld [vmem:[#allocation2 + $0x28] sm:$0xff]  ;;  %v347_v21 = vmov 0.0   ;;  %v43_v32 = vshrl.u32 %v42_v31, 7  ;;  %v187_v4 = vand.u32 127, %v42_v31 }
  0x15   :  { %65 = vperm.xlu1 %307, %v34_v3   ;;  %v274_v9 = vpack.c.bf16 %v88_v8, %v87_v7  ;;  %v277_v14 = vpack.c.bf16 %v90_v11, %v89_v10  ;;  %v91_v15 = vld [vmem:[#allocation2 + $0x30] sm:$0xff]  ;;  %v92_v16 = vld [vmem:[#allocation2 + $0x38] sm:$0xff]  ;;  %v93_v18 = vld [vmem:[#allocation2 + $0x40] sm:$0xff]  ;;  %267 = vmatprep.mubr.msk.f32.mxu0 %vm346_vm0, %v347_v21  ;;  %vm209_vm4 = vcmask 64512  }
  0x16   :  { %272 = vmatpush3.bf16.msra.mxu0 %v271_v6  ;;  %v280_v17 = vpack.c.bf16 %v92_v16, %v91_v15  ;;  %v94_v19 = vld [vmem:[#allocation2 + $0x48] sm:$0xff]  ;;  %v95_v22 = vld [vmem:[#allocation2 + $0x50] sm:$0xff]  ;;  %v96_v23 = vld [vmem:[#allocation2 + $0x58] sm:$0xff]  ;;  %v44_v33 = vsub.s32 0, %v43_v32  ;;  %v60_v36 = vsub.s32 1, %v43_v32  ;;  %v70_v38 = vsub.s32 2, %v43_v32 }
  0x17   :  { %273 = vmatprep.subr.bf16.mxu0 %v343_v2  ;;  %v283_v20 = vpack.c.bf16 %v94_v19, %v93_v18  ;;  %v286_v24 = vpack.c.bf16 %v96_v23, %v95_v22  ;;  %v97_v25 = vld [vmem:[#allocation2 + $0x60] sm:$0xff]  ;;  %v98_v26 = vld [vmem:[#allocation2 + $0x68] sm:$0xff]  ;;  %v99_v28 = vld [vmem:[#allocation2 + $0x70] sm:$0xff]  ;;  %v80_v40 = vsub.s32 3, %v43_v32  ;;  %vm190_vm1 = vcmp.eq.s32.totalorder %v187_v4, 2 }
  0x18   :  { %306 = vset.pattern.permute.xlu0 %v344_v12  ;;  %v289_v27 = vpack.c.bf16 %v98_v26, %v97_v25  ;;  %v100_v29 = vld [vmem:[#allocation2 + $0x78] sm:$0xff]  ;;  %v35_v34 = vld [vmem:[%s410_s1] sm:$0xf]  ;;  %vm189_vm2 = vcmp.eq.s32.totalorder %v187_v4, 1  ;;  %vm188_vm3 = vcmp.eq.s32.totalorder %v187_v4, 0 }
  0x19   :  { %308 = vset.pattern.permute.xlu1 %v345_v13  ;;  %55 = vperm.xlu0 %306, %v34_v3   ;;  %v292_v30 = vpack.c.bf16 %v100_v29, %v99_v28  ;;  %v45_v35 = vrot.slane %v35_v34, %v44_v33  ;;  %v61_v42 = vrot.slane %v35_v34, %v60_v36  ;;  %v216_v43 = vld [vmem:[%s411_s2] ss:$0 sm:$0xff]  ;;  %s348_s2 = smov 127  }
  0x1a   :  { %75 = vperm.xlu1 %308, %v34_v3   ;;  %275 = vmatpush3.bf16.msra.mxu0 %v274_v9  ;;  %v71_v44 = vrot.slane %v35_v34, %v70_v38  ;;  %v81_v45 = vrot.slane %v35_v34, %v80_v40  ;;  %v217_v56 = vld [vmem:[%s413_s4] ss:$0 sm:$0xff] }
  0x1b   :  { %276 = vmatprep.subr.bf16.mxu0 %v343_v2 }
  0x1d   :  { %309 = vset.pattern.permute.xlu0 %v342_v1 }
  0x1e   :  { %310 = vset.pattern.permute.xlu1 %v341_v0  ;;  %278 = vmatpush3.bf16.msra.mxu0 %v277_v14 }
  0x1f   :  { %279 = vmatprep.subr.bf16.mxu0 %v343_v2 }
  0x22   :  { %281 = vmatpush3.bf16.msra.mxu0 %v280_v17 }
  0x23   :  { %282 = vmatprep.subr.bf16.mxu0 %v343_v2 }
  0x26   :  { %284 = vmatpush3.bf16.msra.mxu0 %v283_v20 }
  0x27   :  { %285 = vmatprep.subr.bf16.mxu0 %v343_v2 }
  0x2a   :  { %287 = vmatpush3.bf16.msra.mxu0 %v286_v24 }
  0x2b   :  { %288 = vmatprep.subr.bf16.mxu0 %v343_v2 }
  0x2e   :  { %290 = vmatpush3.bf16.msra.mxu0 %v289_v27 }
  0x2f   :  { %291 = vmatprep.subr.bf16.mxu0 %v343_v2 }
  0x32   :  { %293 = vmatpush3.bf16.msra.mxu0 %v292_v30 }
  0x93   :  { %v40_v37 = vpop.permute.xlu0 %39 }
  0x94   :  { %v66_v39 = vpop.permute.xlu1 %65  ;;  %v46_v41 = vmul.f32 %v45_v35, %v40_v37 }
  0x95   :  { %v72_v50 = vmul.f32 %v71_v44, %v66_v39 }
  0x96   :  { %v53_v48 = vadd.f32 %v216_v43, %v46_v41 }
  0x98   :  { %v56_v46 = vpop.permute.xlu0 %55 }
  0x99   :  { %v76_v47 = vpop.permute.xlu1 %75  ;;  %v62_v49 = vmul.f32 %v61_v42, %v56_v46 }
  0x9a   :  { %v82_v52 = vmul.f32 %v81_v45, %v76_v47 }
  0x9b   :  { %v63_v51 = vadd.f32 %v62_v49, %v53_v48 }
  0x9d   :  { %v73_v53 = vadd.f32 %v72_v50, %v63_v51 }
  0x9f   :  { %v83_v54 = vadd.f32 %v82_v52, %v73_v53 }
  0xa1   :  { %v84_v55 = vmax.f32 %v83_v54, 0.0 }
  0xa3   :  { %268 = vmatmul.mubr.f32.vlgmr.msra.gmra.mrb[0].mxu0 %v84_v55 }
 0x176   :  { %v174_v57 = vpop.f32.mrb[0].mxu0 }
 0x177   :  { %v175_v58 = vadd.f32 %v217_v56, %v174_v57  ;;  %v269_v59 = vpop.f32.mrb[1].mxu0 }
 0x179   :  { %193 = vperm.xlu0 %309, %v175_v58   ;;  %178 = vrot.lane.b32.xlu1 %v175_v58, %s348_s2 }
 0x17d   :  { %311 = vset.pattern.permute.xlu0 %v341_v0 }
 0x1eb   :  { %v179_v60 = vpop.permute.xlu1 %178 }
 0x1ec   :  { %v180_v61 = vsub.f32 %v175_v58, %v179_v60 }
 0x1ee   :  { %v181_v62 = vmul.f32 0.5, %v180_v61 }
 0x1f0   :  { %312 = vtanh.f32 %v181_v62 }
 0x1f8   :  { %v194_v5 = vpop.permute.xlu0 %193 }
 0x1f9   :  { %v196_v7 = vsel %vm190_vm1, %v194_v5, 0.0 }
 0x1fa   :  { %v313_v63 = vpop.eup %312 }
 0x1fb   :  { %v183_v1 = vadd.f32 1.0, %v313_v63 }
 0x1fd   :  { %v184_v2 = vmul.f32 0.5, %v183_v1 }
 0x1ff   :  { %v185_v3 = vsub.f32 1.0, %v184_v2 }
 0x201   :  { %199 = vperm.xlu1 %310, %v185_v3  }
 0x205   :  { %205 = vperm.xlu1 %310, %v184_v2  }
 0x280   :  { %v200_v6 = vpop.permute.xlu1 %199 }
 0x281   :  { %v202_v8 = vsel %vm189_vm2, %v200_v6, %v196_v7 }
 0x284   :  { %v206_v0 = vpop.permute.xlu1 %205 }
 0x285   :  { %v208_v9 = vsel %vm188_vm3, %v206_v0, %v202_v8 }
 0x286   :  { %210 = vst.msk [vmem:[%s414_s5] sm:$0xff] %vm209_vm4, %v208_v9 }
 0x287   :  { %215 = vsyncpa [#allocation3], 1 }

</bundles_post_ra>
